<compile_context>
chip_gen: v5e
topology: v5e:2x2
jax: 0.10.0
libtpu: 0.0.40
codegen_flags: <defaults>
</compile_context>

<pallas_src>
import math
import functools

import jax
import jax.numpy as jnp
from jax import lax
from jax.experimental import pallas as pl
from jax.experimental.pallas import tpu as pltpu


# ---------------------------------------------------------------------------
# helpers
# ---------------------------------------------------------------------------

def _pick_block(dim: int, target: int, quantum: int = 8) -> int:
    """Largest multiple-of-`quantum` tile <= target that divides dim (else full dim).

    Falls back to the full dimension (always a legal block) for awkward sizes.
    """
    if dim <= target:
        return dim
    t0 = (target // quantum) * quantum
    for t in range(t0, quantum - 1, -quantum):
        if dim % t == 0:
            return t
    return dim


def _default_row_target() -> int:
    """512-row tiles on 128 MiB-VMEM chips (v5e/v6e), 256 on v7x (64 MiB)."""
    try:
        return 512 if pltpu.get_tpu_info().vmem_capacity_bytes >= (96 << 20) else 256
    except Exception:
        return 256


_ROW_TARGET = _default_row_target()


def _heads_per_block(n_head: int, d: int) -> int:
    """Smallest divisor hp of n_head with (hp*d) % 128 == 0 (lane-dense blocks);
    falls back to all heads (block width == D == full last dim, also legal)."""
    for hp in range(1, n_head + 1):
        if n_head % hp == 0 and (hp * d) % 128 == 0:
            return hp
    return n_head


def make_pe_table(max_len, d_model, dtype=jnp.float32):
    """Sinusoidal table, identical math to PositionalEncoding.__init__."""
    position = jnp.arange(0, max_len, dtype=jnp.float32)[:, None]
    div_term = jnp.exp(jnp.arange(0, d_model, 2, dtype=jnp.float32)
                       * (-(math.log(10000.0) / d_model)))
    angles = position * div_term
    pe = jnp.zeros((max_len, d_model), dtype=jnp.float32)
    pe = pe.at[:, 0::2].set(jnp.sin(angles))
    pe = pe.at[:, 1::2].set(jnp.cos(angles))
    return pe.astype(dtype)


def _ln(y, gamma, beta, eps):
    """LayerNorm from the spec: a_2*(x-mean)/(std+eps)+b_2, std unbiased (d-1)."""
    d = y.shape[-1]
    mean = jnp.mean(y, axis=-1, keepdims=True)
    diff = y - mean
    var = jnp.sum(diff * diff, axis=-1, keepdims=True) / jnp.float32(d - 1)
    std = jnp.sqrt(var)
    return gamma * diff / (std + eps) + beta


# ---------------------------------------------------------------------------
# kernel 1: fused embedding-scale + positional-encoding add + LayerNorm
# ---------------------------------------------------------------------------

def _embed_pe_ln_kernel(x_ref, pe_ref, g_ref, b_ref, o_ref, *, scale, eps):
    x = x_ref[0].astype(jnp.float32)            # (TS, D)
    pe = pe_ref[...].astype(jnp.float32)        # (TS, D) — reused across batch
    y = x * jnp.float32(scale) + pe             # emb*sqrt(D) + pe  (dropout=id, eval)
    g = g_ref[...].astype(jnp.float32)          # (1, D)
    b = b_ref[...].astype(jnp.float32)          # (1, D)
    o_ref[0] = _ln(y, g, b, jnp.float32(eps)).astype(o_ref.dtype)


def embed_pe_layernorm(x_emb, pe, gamma, beta, *, scale, eps=1e-6):
    """x_emb: (B, S, D) raw embedding rows; pe: (S, D). Returns LN(x*scale + pe)."""
    B, S, D = x_emb.shape
    ts = _pick_block(S, _ROW_TARGET)
    kernel = functools.partial(_embed_pe_ln_kernel, scale=float(scale), eps=float(eps))
    return pl.pallas_call(
        kernel,
        out_shape=jax.ShapeDtypeStruct((B, S, D), x_emb.dtype),
        grid=(S // ts, B),                      # batch innermost -> pe block is reused
        in_specs=[
            pl.BlockSpec((1, ts, D), lambda s, b: (b, s, 0)),
            pl.BlockSpec((ts, D), lambda s, b: (s, 0)),
            pl.BlockSpec((1, D), lambda s, b: (0, 0)),
            pl.BlockSpec((1, D), lambda s, b: (0, 0)),
        ],
        out_specs=pl.BlockSpec((1, ts, D), lambda s, b: (b, s, 0)),
        compiler_params=pltpu.CompilerParams(
            dimension_semantics=("parallel", "parallel")),
    )(x_emb, pe.astype(x_emb.dtype), gamma.reshape(1, D), beta.reshape(1, D))


# ---------------------------------------------------------------------------
# kernel 2: linear (matmul + bias, optional fused ReLU), tiled over rows & Dout
# ---------------------------------------------------------------------------

def _linear_kernel(x_ref, w_ref, b_ref, o_ref, *, relu):
    y = jnp.dot(x_ref[...], w_ref[...], preferred_element_type=jnp.float32)
    y = y + b_ref[...].astype(jnp.float32)
    if relu:
        y = jnp.maximum(y, 0.0)
    o_ref[...] = y.astype(o_ref.dtype)


def linear(x2d, w, b, *, relu=False, tn_target=512):
    """x2d: (N, Din); w: (Din, Dout); b: (Dout,) f32. Output dtype = x2d.dtype."""
    N, Din = x2d.shape
    Dout = w.shape[1]
    tm = _pick_block(N, _ROW_TARGET)
    tn = _pick_block(Dout, tn_target, quantum=128)   # lane-dim tile (128-multiple)
    itemsize = jnp.dtype(x2d.dtype).itemsize
    cost = pl.CostEstimate(
        flops=int(2 * N * Din * Dout),
        transcendentals=0,
        bytes_accessed=int((N * Din + Din * Dout + N * Dout) * itemsize + 4 * Dout))
    kernel = functools.partial(_linear_kernel, relu=bool(relu))
    # TODO(synk): for very large Din also tile K with an f32 VMEM accumulator
    # ("arbitrary" reduction axis) and raise vmem_limit_bytes on v5e.
    return pl.pallas_call(
        kernel,
        out_shape=jax.ShapeDtypeStruct((N, Dout), x2d.dtype),
        grid=(N // tm, Dout // tn),               # Dout innermost -> x block reused
        in_specs=[
            pl.BlockSpec((tm, Din), lambda i, j: (i, 0)),
            pl.BlockSpec((Din, tn), lambda i, j: (0, j)),
            pl.BlockSpec((1, tn), lambda i, j: (0, j)),
        ],
        out_specs=pl.BlockSpec((tm, tn), lambda i, j: (i, j)),
        compiler_params=pltpu.CompilerParams(
            dimension_semantics=("parallel", "parallel")),
        cost_estimate=cost,
    )(x2d, w, b.reshape(1, Dout))


# ---------------------------------------------------------------------------
# kernel 3: linear + residual add + LayerNorm fused (out-projection, FFN-w2)
# ---------------------------------------------------------------------------

def _linear_res_ln_kernel(x_ref, w_ref, b_ref, r_ref, g_ref, bt_ref, o_ref, *, eps):
    y = jnp.dot(x_ref[...], w_ref[...], preferred_element_type=jnp.float32)
    y = y + b_ref[...].astype(jnp.float32) + r_ref[...].astype(jnp.float32)
    g = g_ref[...].astype(jnp.float32)
    bt = bt_ref[...].astype(jnp.float32)
    o_ref[...] = _ln(y, g, bt, jnp.float32(eps)).astype(o_ref.dtype)


def linear_res_ln(x2d, w, b, res2d, gamma, beta, *, eps=1e-6):
    """LN( x2d @ w + b + res2d ). Full Dout kept per block (LN needs whole row)."""
    N, Din = x2d.shape
    Dout = w.shape[1]
    tm = _pick_block(N, _ROW_TARGET)
    itemsize = jnp.dtype(x2d.dtype).itemsize
    cost = pl.CostEstimate(
        flops=int(2 * N * Din * Dout + 8 * N * Dout),
        transcendentals=0,
        bytes_accessed=int((N * Din + Din * Dout + 2 * N * Dout) * itemsize))
    kernel = functools.partial(_linear_res_ln_kernel, eps=float(eps))
    return pl.pallas_call(
        kernel,
        out_shape=jax.ShapeDtypeStruct((N, Dout), x2d.dtype),
        grid=(N // tm,),
        in_specs=[
            pl.BlockSpec((tm, Din), lambda i: (i, 0)),
            pl.BlockSpec((Din, Dout), lambda i: (0, 0)),   # weight resident in VMEM
            pl.BlockSpec((1, Dout), lambda i: (0, 0)),
            pl.BlockSpec((tm, Dout), lambda i: (i, 0)),
            pl.BlockSpec((1, Dout), lambda i: (0, 0)),
            pl.BlockSpec((1, Dout), lambda i: (0, 0)),
        ],
        out_specs=pl.BlockSpec((tm, Dout), lambda i: (i, 0)),
        compiler_params=pltpu.CompilerParams(dimension_semantics=("parallel",)),
        cost_estimate=cost,
    )(x2d, w, b.reshape(1, Dout), res2d, gamma.reshape(1, Dout), beta.reshape(1, Dout))


# ---------------------------------------------------------------------------
# kernel 4: scaled-dot-product attention over lane-dense head-group columns
#           of the (B, S, D) activation layout (no head transposes anywhere)
# ---------------------------------------------------------------------------

def _attention_kernel(q_ref, k_ref, v_ref, o_ref, *, hp, d, scale, recip_approx):
    qb = q_ref[0]                               # (TQ, hp*d), compute dtype
    kb = k_ref[0]                               # (S,  hp*d)
    vb = v_ref[0]
    outs = []
    for j in range(hp):                         # static loop over heads in the group
        lo, hi = j * d, (j + 1) * d
        q = qb[:, lo:hi] * scale                # fold 1/sqrt(d) into q (TQ x d mults)
        # contract on dim 1 of both -> no explicit K transpose (keeps XLU free)
        s = lax.dot_general(q, kb[:, lo:hi], (((1,), (1,)), ((), ())),
                            preferred_element_type=jnp.float32)          # (TQ, S)
        m = jnp.max(s, axis=-1, keepdims=True)
        p = jnp.exp(s - m)
        denom = jnp.sum(p, axis=-1, keepdims=True)
        p = p * pl.reciprocal(denom, approx=recip_approx)                # softmax
        o = jnp.dot(p.astype(vb.dtype), vb[:, lo:hi],
                    preferred_element_type=jnp.float32)                  # (TQ, d)
        outs.append(o)
    o_ref[0] = jnp.concatenate(outs, axis=-1).astype(o_ref.dtype)        # lane-dense store


def attention(q, k, v, *, n_head):
    """q, k, v: (B, S, D) with heads laid out as contiguous d-wide column slices.

    Output is (B, S, D) in the same layout (== torch transpose+contiguous+view)."""
    B, S, D = q.shape
    d = D // n_head
    hp = _heads_per_block(n_head, d)            # heads per grid step (>=128 lanes)
    hg = n_head // hp                           # head groups
    bw = hp * d                                 # block width
    tq = _pick_block(S, 256)                    # Q-row tile (extra parallel axis)
    recip_approx = jnp.dtype(q.dtype) != jnp.dtype(jnp.float32)
    kernel = functools.partial(_attention_kernel, hp=hp, d=d,
                               scale=1.0 / math.sqrt(d), recip_approx=recip_approx)
    itemsize = jnp.dtype(q.dtype).itemsize
    cost = pl.CostEstimate(
        flops=int(4 * B * n_head * S * S * d),
        transcendentals=int(B * n_head * S * S),
        bytes_accessed=int(4 * B * S * D * itemsize))
    q_spec = pl.BlockSpec((1, tq, bw), lambda b, h, qi: (b, qi, h))
    kv_spec = pl.BlockSpec((1, S, bw), lambda b, h, qi: (b, 0, h))  # invariant over qi
    return pl.pallas_call(
        kernel,
        out_shape=jax.ShapeDtypeStruct((B, S, D), q.dtype),
        grid=(B, hg, S // tq),
        in_specs=[q_spec, kv_spec, kv_spec],
        out_specs=pl.BlockSpec((1, tq, bw), lambda b, h, qi: (b, qi, h)),
        compiler_params=pltpu.CompilerParams(
            dimension_semantics=("parallel", "parallel", "parallel")),
        cost_estimate=cost,
    )(q, k, v)


# ---------------------------------------------------------------------------
# Encoder forward (eval mode: all dropouts are identity)
# ---------------------------------------------------------------------------

def encoder_layer(x, lp, *, n_head):
    B, S, D = x.shape
    x2d = x.reshape(B * S, D)

    # fused QKV projection: one matmul, (D, 3D) weight
    qkv = linear(x2d, lp["w_qkv"], lp["b_qkv"]).reshape(B, S, 3 * D)
    q, k, v = qkv[..., :D], qkv[..., D:2 * D], qkv[..., 2 * D:]   # column slices only
    o = attention(q, k, v, n_head=n_head)                          # (B, S, D)

    # out-projection fused with residual add + LayerNorm
    x2d = linear_res_ln(o.reshape(B * S, D), lp["wo"], lp["bo"],
                        x2d, lp["attn_ln_g"], lp["attn_ln_b"])

    # position-wise feed-forward; w2 fused with residual add + LayerNorm
    h = linear(x2d, lp["w1"], lp["b1"], relu=True)
    x2d = linear_res_ln(h, lp["w2"], lp["b2"],
                        x2d, lp["ffn_ln_g"], lp["ffn_ln_b"])
    return x2d.reshape(B, S, D)


def prepare_params(params, dtype=jnp.float32):
    """Cast weights/activation-side tensors to `dtype` (bf16 for MXU efficiency),
    fuse Q/K/V weights, keep biases and LayerNorm affines in f32."""
    f32 = jnp.float32
    layers = []
    for lp in params["layers"]:
        layers.append(dict(
            w_qkv=jnp.concatenate([lp["wq"], lp["wk"], lp["wv"]], axis=1).astype(dtype),
            b_qkv=jnp.concatenate([lp["bq"], lp["bk"], lp["bv"]], axis=0).astype(f32),
            wo=lp["wo"].astype(dtype), bo=lp["bo"].astype(f32),
            attn_ln_g=lp["attn_ln_g"].astype(f32), attn_ln_b=lp["attn_ln_b"].astype(f32),
            w1=lp["w1"].astype(dtype), b1=lp["b1"].astype(f32),
            w2=lp["w2"].astype(dtype), b2=lp["b2"].astype(f32),
            ffn_ln_g=lp["ffn_ln_g"].astype(f32), ffn_ln_b=lp["ffn_ln_b"].astype(f32),
        ))
    return dict(
        emb=params["emb"].astype(dtype),
        pe=params["pe"].astype(dtype),
        ln_g=params["ln_g"].astype(f32),
        ln_b=params["ln_b"].astype(f32),
        layers=layers,
    )


def encoder_forward(tokens, prepped, *, n_head):
    emb_table = prepped["emb"]
    D = emb_table.shape[1]
    B, S = tokens.shape
    # Embedding row gather stays in XLA (data-dependent gather).
    x_emb = jnp.take(emb_table, tokens, axis=0)                     # (B, S, D)
    x = embed_pe_layernorm(x_emb, prepped["pe"][:S], prepped["ln_g"], prepped["ln_b"],
                           scale=math.sqrt(D))
    for lp in prepped["layers"]:
        x = encoder_layer(x, lp, n_head=n_head)
    return x


# ---------------------------------------------------------------------------
# pure-JAX reference (same math as the PyTorch module, eval mode, f32)
# ---------------------------------------------------------------------------

def reference_forward(tokens, params, *, n_head, eps=1e-6):
    def ln(x, g, b):
        d = x.shape[-1]
        mean = x.mean(-1, keepdims=True)
        diff = x - mean
        std = jnp.sqrt((diff * diff).sum(-1, keepdims=True) / (d - 1))
        return g * diff / (std + eps) + b

    emb_table = params["emb"]
    D = emb_table.shape[1]
    B, S = tokens.shape
    x = emb_table[tokens] * math.sqrt(D) + params["pe"][None, :S, :]
    x = ln(x, params["ln_g"], params["ln_b"])
    for lp in params["layers"]:
        d = D // n_head
        def heads(t):
            return t.reshape(B, S, n_head, d).transpose(0, 2, 1, 3)
        q = heads(x @ lp["wq"] + lp["bq"])
        k = heads(x @ lp["wk"] + lp["bk"])
        v = heads(x @ lp["wv"] + lp["bv"])
        s = (q @ jnp.swapaxes(k, -1, -2)) / math.sqrt(d)
        p = jax.nn.softmax(s, axis=-1)
        o = (p @ v).transpose(0, 2, 1, 3).reshape(B, S, D)
        o = o @ lp["wo"] + lp["bo"]
        x = ln(o + x, lp["attn_ln_g"], lp["attn_ln_b"])
        h = jnp.maximum(x @ lp["w1"] + lp["b1"], 0.0)
        y = h @ lp["w2"] + lp["b2"]
        x = ln(y + x, lp["ffn_ln_g"], lp["ffn_ln_b"])
    return x


# ---------------------------------------------------------------------------
# demo
# ---------------------------------------------------------------------------

if __name__ == "__main__":
    B, S, D = 2, 16, 128
    VOCAB, N_LAYERS, N_HEAD, D_FF = 50, 2, 4, 256
    MAX_LEN = 5000

    key = jax.random.PRNGKey(0)
    keys = iter(jax.random.split(key, 64))

    def nrm(shape, scale=0.1):
        return scale * jax.random.normal(next(keys), shape, dtype=jnp.float32)

    layers = []
    for _ in range(N_LAYERS):
        layers.append(dict(
            wq=nrm((D, D)), bq=nrm((D,)),
            wk=nrm((D, D)), bk=nrm((D,)),
            wv=nrm((D, D)), bv=nrm((D,)),
            wo=nrm((D, D)), bo=nrm((D,)),
            attn_ln_g=jnp.ones((D,), jnp.float32), attn_ln_b=jnp.zeros((D,), jnp.float32),
            w1=nrm((D, D_FF)), b1=nrm((D_FF,)),
            w2=nrm((D_FF, D)), b2=nrm((D,)),
            ffn_ln_g=jnp.ones((D,), jnp.float32), ffn_ln_b=jnp.zeros((D,), jnp.float32),
        ))

    params = dict(
        emb=nrm((VOCAB, D), scale=1.0),
        pe=make_pe_table(MAX_LEN, D),
        ln_g=jnp.ones((D,), jnp.float32),
        ln_b=jnp.zeros((D,), jnp.float32),
        layers=layers,
    )

    tokens = jax.random.randint(next(keys), (B, S), 0, VOCAB, dtype=jnp.int32)

    ref = jax.block_until_ready(reference_forward(tokens, params, n_head=N_HEAD))

    # f32 path: strict correctness vs the pure-JAX reference
    out32 = jax.block_until_ready(
        encoder_forward(tokens, prepare_params(params, jnp.float32), n_head=N_HEAD))
    assert out32.shape == (B, S, D)
    assert bool(jnp.allclose(out32, ref, atol=5e-4, rtol=5e-4)), "f32 mismatch vs reference"

    # bf16 MXU path (the fast path per the perf review): loose numerical check
    out16 = jax.block_until_ready(
        encoder_forward(tokens, prepare_params(params, jnp.bfloat16), n_head=N_HEAD))
    assert out16.shape == (B, S, D)
    assert bool(jnp.allclose(out16.astype(jnp.float32), ref, atol=1e-1, rtol=1e-1)), \
        "bf16 mismatch vs reference"

    print("KERNEL_OK")
</pallas_src>

<mosaic_0001>
module attributes {stable_mosaic.version = 11 : i64} {
  func.func @_embed_pe_ln_kernel(%arg0: i32, %arg1: i32, %arg2: memref<1x16x128xf32, #tpu.memory_space<vmem>>, %arg3: memref<16x128xf32, #tpu.memory_space<vmem>>, %arg4: memref<1x128xf32, #tpu.memory_space<vmem>>, %arg5: memref<1x128xf32, #tpu.memory_space<vmem>>, %arg6: memref<1x16x128xf32, #tpu.memory_space<vmem>>) attributes {dimension_semantics = [#tpu.dimension_semantics<parallel>, #tpu.dimension_semantics<parallel>], iteration_bounds = array<i64: 1, 2>, scalar_prefetch = 0 : i64, scratch_operands = 0 : i64, tpu.core_type = #tpu.core_type<tc>, window_params = [{transform_indices = @transform_0, window_bounds = array<i64: 1, 16, 128>}, {transform_indices = @transform_1, window_bounds = array<i64: 16, 128>}, {pipeline_mode = #tpu.pipeline_mode<synchronous>, transform_indices = @transform_2, window_bounds = array<i64: 1, 128>}, {pipeline_mode = #tpu.pipeline_mode<synchronous>, transform_indices = @transform_3, window_bounds = array<i64: 1, 128>}, {transform_indices = @transform_4, window_bounds = array<i64: 1, 16, 128>}]} {
    %c0 = arith.constant 0 : index
    %c0_0 = arith.constant 0 : index
    %c0_1 = arith.constant 0 : index
    %0 = vector.load %arg2[%c0, %c0_0, %c0_1] : memref<1x16x128xf32, #tpu.memory_space<vmem>>, vector<1x16x128xf32>
    %1 = vector.shape_cast %0 : vector<1x16x128xf32> to vector<16x128xf32>
    %c0_2 = arith.constant 0 : index
    %c0_3 = arith.constant 0 : index
    %2 = vector.load %arg3[%c0_2, %c0_3] : memref<16x128xf32, #tpu.memory_space<vmem>>, vector<16x128xf32>
    %cst = arith.constant 11.3137083 : f32
    %3 = vector.broadcast %cst : f32 to vector<16x128xf32>
    %4 = arith.mulf %1, %3 : vector<16x128xf32>
    %5 = arith.addf %4, %2 : vector<16x128xf32>
    %c0_4 = arith.constant 0 : index
    %c0_5 = arith.constant 0 : index
    %6 = vector.load %arg4[%c0_4, %c0_5] : memref<1x128xf32, #tpu.memory_space<vmem>>, vector<1x128xf32>
    %c0_6 = arith.constant 0 : index
    %c0_7 = arith.constant 0 : index
    %7 = vector.load %arg5[%c0_6, %c0_7] : memref<1x128xf32, #tpu.memory_space<vmem>>, vector<1x128xf32>
    %cst_8 = arith.constant dense<0.000000e+00> : vector<16xf32>
    %8 = vector.multi_reduction <add>, %5, %cst_8 [1] : vector<16x128xf32> to vector<16xf32>
    %9 = vector.shape_cast %8 : vector<16xf32> to vector<16x1xf32>
    %cst_9 = arith.constant 1.280000e+02 : f32
    %10 = vector.broadcast %cst_9 : f32 to vector<16x1xf32>
    %11 = arith.divf %9, %10 : vector<16x1xf32>
    %12 = vector.broadcast %11 : vector<16x1xf32> to vector<16x128xf32>
    %13 = arith.subf %5, %12 : vector<16x128xf32>
    %14 = arith.mulf %13, %13 : vector<16x128xf32>
    %cst_10 = arith.constant dense<0.000000e+00> : vector<16xf32>
    %15 = vector.multi_reduction <add>, %14, %cst_10 [1] : vector<16x128xf32> to vector<16xf32>
    %16 = vector.shape_cast %15 : vector<16xf32> to vector<16x1xf32>
    %cst_11 = arith.constant 1.270000e+02 : f32
    %17 = vector.broadcast %cst_11 : f32 to vector<16x1xf32>
    %18 = arith.divf %16, %17 : vector<16x1xf32>
    %19 = math.sqrt %18 : vector<16x1xf32>
    %20 = vector.broadcast %6 : vector<1x128xf32> to vector<16x128xf32>
    %21 = arith.mulf %20, %13 : vector<16x128xf32>
    %cst_12 = arith.constant 9.99999997E-7 : f32
    %22 = vector.broadcast %cst_12 : f32 to vector<16x1xf32>
    %23 = arith.addf %19, %22 : vector<16x1xf32>
    %24 = vector.broadcast %23 : vector<16x1xf32> to vector<16x128xf32>
    %25 = arith.divf %21, %24 : vector<16x128xf32>
    %26 = vector.broadcast %7 : vector<1x128xf32> to vector<16x128xf32>
    %27 = arith.addf %25, %26 : vector<16x128xf32>
    %c0_13 = arith.constant 0 : index
    %c0_14 = arith.constant 0 : index
    %c0_15 = arith.constant 0 : index
    %28 = vector.load %arg6[%c0_13, %c0_14, %c0_15] : memref<1x16x128xf32, #tpu.memory_space<vmem>>, vector<1x16x128xf32>
    %29 = vector.shape_cast %28 : vector<1x16x128xf32> to vector<16x128xf32>
    %30 = vector.shape_cast %27 : vector<16x128xf32> to vector<1x16x128xf32>
    tpu.vector_store %arg6[%c0_13, %c0_14, %c0_15], %30 {strides = array<i32>} : memref<1x16x128xf32, #tpu.memory_space<vmem>>, vector<1x16x128xf32>,
    return
  }
  func.func @transform_0(%arg0: i32, %arg1: i32) -> (i32, i32, i32) {
    %c0_i32 = arith.constant 0 : i32
    %c0_i32_0 = arith.constant 0 : i32
    return %arg1, %arg0, %c0_i32 : i32, i32, i32
  }
  func.func @transform_1(%arg0: i32, %arg1: i32) -> (i32, i32) {
    %c0_i32 = arith.constant 0 : i32
    %c0_i32_0 = arith.constant 0 : i32
    return %arg0, %c0_i32 : i32, i32
  }
  func.func @transform_2(%arg0: i32, %arg1: i32) -> (i32, i32) {
    %c0_i32 = arith.constant 0 : i32
    %c0_i32_0 = arith.constant 0 : i32
    %c0_i32_1 = arith.constant 0 : i32
    return %c0_i32, %c0_i32_0 : i32, i32
  }
  func.func @transform_3(%arg0: i32, %arg1: i32) -> (i32, i32) {
    %c0_i32 = arith.constant 0 : i32
    %c0_i32_0 = arith.constant 0 : i32
    %c0_i32_1 = arith.constant 0 : i32
    return %c0_i32, %c0_i32_0 : i32, i32
  }
  func.func @transform_4(%arg0: i32, %arg1: i32) -> (i32, i32, i32) {
    %c0_i32 = arith.constant 0 : i32
    %c0_i32_0 = arith.constant 0 : i32
    return %arg1, %arg0, %c0_i32 : i32, i32, i32
  }
}

</mosaic_0001>

<bundles_post_ra>
// kernel: tpu_custom_call.1
= control target key start
LH: loop header
LB: loop body
LE: loop exit
PB: predicated region body
PF: predicated region fallthrough
CT: control target
= control target key end

     0   :  { %s956_s0 = inlined_call_operand.hbm [shape: f32[2,16,128], index: 0, kind: input, shape index: {}]   ;;  %s957_s1 = inlined_call_operand.hbm [shape: f32[16,128], index: 1, kind: input, shape index: {}]   ;;  %s958_s2 = inlined_call_operand.vmem [shape: f32[1,128], index: 2, kind: input, shape index: {}]   ;;  %s959_s3 = inlined_call_operand.vmem [shape: f32[1,128], index: 3, kind: input, shape index: {}]   ;;  %s960_s4 = inlined_call_operand.hbm [shape: f32[2,16,128], index: 4, kind: output, shape index: {}]  }
   0x1   :  { %964 = sst [smem:[#allocation12_spill]] %s957_s1 }
   0x2   :  { %9 = vsyncpa [#allocation3], 0 }
   0x3   :  { %11 = vsyncpa [#allocation3 + $0x1], 0 }
   0x4   :  { %12 = vsyncpa [#allocation6], 0 }
   0x5   :  { %13 = vsyncpa [#allocation4], 0 }
   0x6   :  { %15 = vsyncpa [#allocation4 + $0x1], 0  ;;  %s781_s15 = smov 0   ;;  %s783_s16 = smov 0  }
   0x7   :  { %s785_s17 = smov 0   ;;  %s787_s18 = smov 0  }
   0x8   :  { %s789_s19 = smov 0   ;;  %s791_s20 = smov 0  }
   0x9 LB: > { %s489_s21 = sadd.s32 4294967295, %s747_s20   ;;  %s490_s22 = sadd.s32 4294967294, %s747_s20   ;;  %s747_s20 = sphi %s791_s20, %s21_s20   ;;  %s743_s19 = sphi %s789_s19, %s981_s19   ;;  %s739_s18 = sphi %s787_s18, %s980_s18   ;;  %s735_s17 = sphi %s785_s17, %s979_s17   ;;  %s731_s16 = sphi %s783_s16, %s978_s16   ;;  %s727_s15 = sphi %s781_s15, %s977_s15  }
   0xa   : > { %p55_p0 = scmp.ne.s32.totalorder %s731_s16, %s727_s15  ;;  %p815_p1 = scmp.eq.s32.totalorder %s489_s21, 0 }
   0xb   : > { %p819_p2 = scmp.eq.s32.totalorder %s489_s21, 1  ;;  %p155_p3 = scmp.eq.s32.totalorder %s490_s22, 1 }
   0xc   : > { %p825_p4 = por %p815_p1, %p55_p0  ;;  %p491_p5 = scmp.ge.s32.totalorder %s747_s20, 1 }
   0xd   : > { %p830_p6 = por %p155_p3, %p55_p0  ;;  %p162_p7 = scmp.lt.s32.totalorder %s747_s20, 3 }
   0xe   : > { %s969_s1 = sld [smem:[#allocation12_spill]]  ;;  %s749_s5 = smov [#allocation5]  }
   0xf   : > { %p838_p8 = pnand %p491_p5, %p162_p7  ;;  %s178_s6 = sshll.u32 %s749_s5, 4  ;;  %s179_s6 = int_to_ptr.vmem [resolvable:$true] %s178_s6 }
  0x10   : > { %p493_p11 = scmp.ge.s32.totalorder %s747_s20, 2  ;;  %s961_s7 = smov 128  }
  0x11   : > { %p516_p9 = pneg %p838_p8  ;;  %s962_s8 = smov 8  }
  0x12   : > { %s30_s9 = sadd.s32 1, %s743_s19  ;;  %s42_s10 = sadd.s32 1, %s735_s17 }
  0x13   : > { %p517_p10 = pnand %p516_p9, %p815_p1  ;;  %p31_p12 = scmp.ge.s32.totalorder %s30_s9, 2 }
  0x14   : > { %s176_s29 = sshll.u32 %s969_s1, 4  ;;  %p49_p13 = scmp.ne.s32.totalorder %s735_s17, %s731_s16  ;;  %s177_s29 = int_to_ptr.hbm [resolvable:$true] %s176_s29 }
  0x15   : > { %519 = dma.hbm_to_vmem [thread:$0]  (!%p517_p10), %s177_s29, 256, %s179_s6, [#allocation6], %s961_s7, %s961_s7, %s962_s8  }
  0x16   : > { %p50_p0 = scmp.eq.s32.totalorder %s747_s20, 0  ;;  %s983_s9 = smov (%p31_p12, %s30_s9), 0 }
  0x17   : > { %971 = sst [smem:[#allocation11_spill]] %s983_s9  ;;  %p863_p5 = por %p819_p2, %p49_p13 }
  0x18   : > { %p857_p3 = por %p50_p0, %p49_p13  ;;  %s37_s13 = ssub.s32 %s743_s19, %s983_s9 }
  0x19   : > { %p529_p7 = scmp.lt.s32.totalorder %s747_s20, 2  ;;  %p40_p9 = scmp.eq.s32.totalorder %s37_s13, 0 }
  0x1a   : > { %s198_s14 = sand.u32 1, %s735_s17   ;;  %s506_s27 = sshll.u32 %s743_s19, 4 }
  0x1b   : > { %s494_s21 = sshll.u32 %s198_s14, 4  ;;  %s209_s5 = scalar_lea.hbm %s956_s0, %s506_s27 }
  0x1c   : > { %s872_s22 = scalar_select %p40_p9, %s735_s17, %s42_s10  }
  0x1d   : > { %s202_s6 = scalar_lea.vmem [#allocation2], %s494_s21  ;;  %s210_s24 = sshll.u32 %s209_s5, 4  ;;  %s211_s24 = int_to_ptr.hbm [resolvable:$true] %s210_s24 }
  0x1e   : > { %s212_s7 = sshll.u32 %s202_s6, 4  ;;  %p521_p2 = pnand %p529_p7, %p857_p3  ;;  %s213_s7 = int_to_ptr.vmem [resolvable:$true] %s212_s7 }
  0x1f   : > { %s199_s8 = scalar_lea.sflag [#allocation3], %s198_s14  ;;  %s974_s1 = smov 8  }
  0x20   : > { %s975_s9 = smov 128   ;;  %224 = sbr.rel (%p838_p8) target bundleno = 341 (0x155), region = 36 }
  0x21   : > { %523 = dma.hbm_to_vmem [thread:$0]  (!%p521_p2), %s211_s24, 256, %s213_s7, %s199_s8, %s975_s9, %s975_s9, %s974_s1  }
  0x22   : > { %s886_s10 = sand.u32 (!%p838_p8), 1, %s731_s16  }
  0x23   : > { %s498_s13 = sshll.u32 (!%p838_p8), %s886_s10, 4  ;;  %s227_s21 = scalar_lea.sflag (!%p838_p8), [#allocation3], %s886_s10 }
  0x24   : > { %s230_s11 = scalar_lea.vmem (!%p838_p8), [#allocation2], %s498_s13 }
  0x25   : > { %714 = dma.done.wait (%p825_p4), %s227_s21, 256  }
  0x26   : > { %716 = vsyncadd (%p825_p4), %s227_s21, 4294967040 }
  0x27   : > { %718 = dma.done.wait (%p815_p1), [#allocation6], 256  }
  0x28   : > { %720 = vsyncadd (%p815_p1), [#allocation6], 4294967040  ;;  %v264_v0 = vld [vmem:[%s230_s11] sm:$0xff]  ;;  %v265_v3 = vld [vmem:[%s230_s11 + $0x8] sm:$0xff]  ;;  %v752_v8 = vmov 128.0   ;;  %v753_v23 = vmov 127.0  }
  0x29   : > { %v266_v1 = vld [vmem:[#allocation5] sm:$0xff]  ;;  %v268_v2 = vmul.f32 11.313708, %v264_v0  ;;  %v269_v5 = vmul.f32 11.313708, %v265_v3  ;;  %v267_v6 = vld [vmem:[#allocation5 + $0x8] sm:$0xff]  ;;  %589 = vrcp.f32 %v752_v8 }
  0x2a   : > { %591 = vrcp.f32 %v753_v23  ;;  %v587_v60 = vld [vmem:[%s958_s2] ss:$0 sm:$0xff]  ;;  %s507_s7 = sshll.u32 %s739_s18, 4  ;;  %s260_s27 = scalar_lea.vmem [#allocation7], %s498_s13 }
  0x2b   : > { %v270_v4 = vadd.f32 %v268_v2, %v266_v1  ;;  %v271_v7 = vadd.f32 %v269_v5, %v267_v6  ;;  %v588_v5 = vld [vmem:[%s959_s3] ss:$0 sm:$0xff]  ;;  %s386_s14 = scalar_lea.hbm %s960_s4, %s507_s7  ;;  %s387_s18 = sshll.u32 %s260_s27, 4  ;;  %s388_s18 = int_to_ptr.vmem [resolvable:$true] %s387_s18 }
  0x2c   : > { %s389_s28 = sshll.u32 %s386_s14, 4  ;;  %s373_s29 = scalar_lea.sflag [#allocation4], %s886_s10  ;;  %s390_s28 = int_to_ptr.hbm [resolvable:$true] %s389_s28 }
  0x2d   : > { %274 = vadd.xlane.f32.xlu0 %v270_v4  ;;  %s675_s5 = sshra.s32 %s390_s28, 4  ;;  %s681_s21 = scalar_lea.hbm %s960_s4, 32  ;;  %s676_s5 = int_to_ptr.hbm [resolvable:$true] %s675_s5 }
  0x2e   : > { %s677_s6 = scalar_lea.hbm %s676_s5, 16  ;;  %p682_p10 = scmp.lt.s32.totalorder %s676_s5, %s960_s4 }
  0x2f   : > { %v590_v9 = vpop.eup %589  ;;  %p678_p1 = scmp.ne.s32.totalorder %s676_s5, %s677_s6  ;;  %p683_p12 = scmp.lt.s32.totalorder %s681_s21, %s677_s6 }
  0x30   : > { %v279_v10 = vmul.f32 128.0, %v590_v9  ;;  %vm283_vm0 = vweird.f32 %v590_v9  ;;  %v592_v24 = vpop.eup %591 }
  0x31   : > { %v296_v25 = vmul.f32 127.0, %v592_v24  ;;  %vm300_vm1 = vweird.f32 %v592_v24  ;;  %p679_p4 = pnand %p678_p1, %p863_p5  ;;  %p684_p13 = por %p683_p12, %p682_p10 }
  0x32   : > { %v280_v11 = vsub.f32 1.0, %v279_v10 }
  0x33   : > { %v297_v26 = vsub.f32 1.0, %v296_v25  ;;  %p680_p8 = pneg %p679_p4 }
  0x34   : > { %v281_v12 = vmul.f32 %v590_v9, %v280_v11 }
  0x35   : > { %276 = vadd.xlane.f32.xlu0 %v271_v7  ;;  %v298_v27 = vmul.f32 %v592_v24, %v297_v26  ;;  %p685_p0 = pnand %p684_p13, %p680_p8 }
  0x36   : > { %v282_v13 = vadd.f32 %v590_v9, %v281_v12 }
  0x37   : > { %v299_v28 = vadd.f32 %v592_v24, %v298_v27 }
  0x38   : > { %v284_v14 = vsel %vm283_vm0, %v590_v9, %v282_v13 }
  0x39   : > { %v301_v29 = vsel %vm300_vm1, %v592_v24, %v299_v28 }
  0xa0   : > { %v275_v15 = vpop.xlane.xlu0 %274 }
  0xa1   : > { %v285_v16 = vmul.f32 %v284_v14, %v275_v15 }
  0xa3   : > { %v900_v17 = vsub.f32 %v270_v4, %v285_v16 }
  0xa5   : > { %v289_v18 = vmul.f32 %v900_v17, %v900_v17  ;;  %v331_v2 = vmul.f32 %v587_v60, %v900_v17 }
  0xa7   : > { %291 = vadd.xlane.f32.xlu1 %v289_v18 }
  0xa8   : > { %v277_v19 = vpop.xlane.xlu0 %276 }
  0xa9   : > { %v286_v20 = vmul.f32 %v284_v14, %v277_v19 }
  0xab   : > { %v904_v21 = vsub.f32 %v271_v7, %v286_v20 }
  0xad   : > { %v290_v22 = vmul.f32 %v904_v21, %v904_v21  ;;  %v332_v15 = vmul.f32 %v587_v60, %v904_v21 }
  0xaf   : > { %293 = vadd.xlane.f32.xlu1 %v290_v22 }
 0x11a   : > { %v292_v30 = vpop.xlane.xlu1 %291 }
 0x11b   : > { %v302_v31 = vmul.f32 %v301_v29, %v292_v30 }
 0x11d   : > { %593 = vrsqrt.f32 %v302_v31  ;;  %vm311_vm2 = vcmp.eq.f32.partialorder %v302_v31, inf  ;;  %v314_v44 = vand.u32 2147483648, %v302_v31  ;;  %vm313_vm3 = vcmp.eq.f32.partialorder %v302_v31, 0.0 }
 0x122   : > { %v294_v32 = vpop.xlane.xlu1 %293 }
 0x123   : > { %v594_v33 = vpop.eup %593  ;;  %v303_v34 = vmul.f32 %v301_v29, %v294_v32 }
 0x124   : > { %v305_v35 = vmul.f32 %v594_v33, %v302_v31 }
 0x125   : > { %595 = vrsqrt.f32 %v303_v34  ;;  %vm323_vm4 = vcmp.eq.f32.partialorder %v303_v34, inf  ;;  %v326_v52 = vand.u32 2147483648, %v303_v34  ;;  %vm325_vm5 = vcmp.eq.f32.partialorder %v303_v34, 0.0 }
 0x126   : > { %v306_v36 = vmul.f32 %v594_v33, %v305_v35 }
 0x128   : > { %v307_v37 = vmul.f32 0.5, %v306_v36 }
 0x12a   : > { %v308_v38 = vsub.f32 1.5, %v307_v37 }
 0x12b   : > { %v596_v39 = vpop.eup %595 }
 0x12c   : > { %v309_v40 = vmul.f32 %v594_v33, %v308_v38  ;;  %v317_v41 = vmul.f32 %v596_v39, %v303_v34 }
 0x12e   : > { %v310_v42 = vmul.f32 %v309_v40, %v302_v31  ;;  %v318_v43 = vmul.f32 %v596_v39, %v317_v41 }
 0x130   : > { %v312_v45 = vsel %vm311_vm2, %v302_v31, %v310_v42  ;;  %v319_v46 = vmul.f32 0.5, %v318_v43 }
 0x131   : > { %v315_v47 = vsel %vm313_vm3, %v314_v44, %v312_v45 }
 0x132   : > { %v333_v48 = vadd.f32 1e-06, %v315_v47  ;;  %v320_v49 = vsub.f32 1.5, %v319_v46 }
 0x134   : > { %597 = vrcp.f32 %v333_v48  ;;  %v321_v50 = vmul.f32 %v596_v39, %v320_v49  ;;  %v346_v59 = vand.u32 2147483648, %v333_v48  ;;  %v344_v62 = vand.u32 2147483647, %v333_v48 }
 0x135   : > { %vm340_vm7 = vweird.f32 %v333_v48 }
 0x136   : > { %v322_v51 = vmul.f32 %v321_v50, %v303_v34  ;;  %v347_v1 = vor.u32 1.1754944e-38, %v346_v59  ;;  %vm345_vm9 = vcmp.eq.f32.partialorder %v344_v62, 8.507059e+37 }
 0x138   : > { %v324_v53 = vsel %vm323_vm4, %v303_v34, %v322_v51 }
 0x139   : > { %v327_v54 = vsel %vm325_vm5, %v326_v52, %v324_v53 }
 0x13a   : > { %v598_v55 = vpop.eup %597  ;;  %v334_v56 = vadd.f32 1e-06, %v327_v54 }
 0x13b   : > { %v336_v57 = vmul.f32 %v598_v55, %v333_v48  ;;  %vm341_vm6 = vweird.f32 %v598_v55 }
 0x13c   : > { %599 = vrcp.f32 %v334_v56  ;;  %vm342_vm8 = vmor %vm340_vm7, %vm341_vm6  ;;  %v361_v9 = vand.u32 2147483648, %v334_v56  ;;  %v359_v11 = vand.u32 2147483647, %v334_v56  ;;  %vm355_vm11 = vweird.f32 %v334_v56 }
 0x13d   : > { %v337_v58 = vsub.f32 1.0, %v336_v57 }
 0x13e   : > { %v362_v14 = vor.u32 1.1754944e-38, %v361_v9  ;;  %vm360_vm13 = vcmp.eq.f32.partialorder %v359_v11, 8.507059e+37 }
 0x13f   : > { %v338_v61 = vmul.f32 %v598_v55, %v337_v58 }
 0x141   : > { %v339_v63 = vadd.f32 %v598_v55, %v338_v61 }
 0x142   : > { %v600_v0 = vpop.eup %599 }
 0x143   : > { %v343_v3 = vsel %vm342_vm8, %v598_v55, %v339_v63  ;;  %v351_v4 = vmul.f32 %v600_v0, %v334_v56  ;;  %vm356_vm10 = vweird.f32 %v600_v0 }
 0x144   : > { %v348_v6 = vsel %vm345_vm9, %v347_v1, %v343_v3  ;;  %vm357_vm12 = vmor %vm355_vm11, %vm356_vm10 }
 0x145   : > { %v349_v7 = vmul.f32 %v348_v6, %v331_v2  ;;  %v352_v8 = vsub.f32 1.0, %v351_v4 }
 0x147   : > { %v353_v10 = vmul.f32 %v600_v0, %v352_v8  ;;  %v368_v12 = vadd.f32 %v588_v5, %v349_v7 }
 0x149   : > { %v354_v13 = vadd.f32 %v600_v0, %v353_v10  ;;  %370 = vst [vmem:[%s260_s27] sm:$0xff] %v368_v12 }
 0x14b   : > { %v358_v16 = vsel %vm357_vm12, %v600_v0, %v354_v13 }
 0x14c   : > { %v363_v17 = vsel %vm360_vm13, %v362_v14, %v358_v16 }
 0x14d   : > { %v364_v18 = vmul.f32 %v363_v17, %v332_v15 }
 0x14f   : > { %v369_v19 = vadd.f32 %v588_v5, %v364_v18 }
 0x151   : > { %371 = vst [vmem:[%s260_s27 + $0x8] sm:$0xff] %v369_v19 }
 0x152   : > { %688 = shalt.err (!%p685_p0)
}
 0x153   : > { %s754_s10 = smov 128   ;;  %s755_s23 = smov 8  }
 0x154   : > { %514 = dma.vmem_to_hbm [thread:$0]  (%p863_p5), %s388_s18, 256, %s390_s28, %s373_s29, %s754_s10, %s754_s10, %s755_s23  }
 0x155 PF: > { %s404_s25 = sand.u32 1, %s727_s15   ;;  %p525_p3 = pnand %p493_p11, %p830_p6 }
 0x156   : > { %s405_s30 = scalar_lea.sflag [#allocation4], %s404_s25 }
 0x157   : > { %p526_p7 = pneg %p525_p3 }
 0x159   : > { %722 = dma.done.wait (%p526_p7), %s405_s30, 256  }
 0x15a   : > { %724 = vsyncadd (%p526_p7), %s405_s30, 4294967040  ;;  %s21_s20 = sadd.s32 1, %s747_s20   ;;  %s976_s12 = sld [smem:[#allocation11_spill]] }
 0x15b   : > { %p18_p9 = scmp.ge.s32.totalorder %s21_s20, 4   ;;  %s977_s15 = smov %s731_s16 }
 0x15c   : > { %s978_s16 = smov %s735_s17  ;;  %s979_s17 = smov %s872_s22 }
 0x15d   : > { %s980_s18 = smov %s743_s19  ;;  %20 = sbr.rel (!%p18_p9) target bundleno = 9 (0x9), region = 86 }
 0x160   : > { %s981_s19 = smov %s976_s12 }
 0x162   :  { %411 = vsyncpa [#allocation3], 1 }
 0x163   :  { %413 = vsyncpa [#allocation3 + $0x1], 1 }
 0x164   :  { %414 = vsyncpa [#allocation6], 1 }
 0x165   :  { %415 = vsyncpa [#allocation4], 1 }
 0x166   :  { %417 = vsyncpa [#allocation4 + $0x1], 1 }

</bundles_post_ra>
